<compile_context>
chip_gen: v5e
topology: v5e:2x2
jax: 0.10.0
libtpu: 0.0.40
codegen_flags: <defaults>
</compile_context>

<pallas_src>
import math

import jax
import jax.numpy as jnp
from jax.experimental import pallas as pl
from jax.experimental.pallas import tpu as pltpu

BN_EPS = 1e-5
NEG_SLOPE = 0.1

# Architecture constants (input_dim=16, hidden_sizes=[32, 16], output=2).
D_IN, H1, H2, D_OUT = 16, 32, 16, 2

# Merged bf16 parameter slab (80, 128); every region starts on a 16-row boundary
# so all ref slices are aligned to the bf16 (16,128) tile.
SLAB_LANES = 128
W1_R0 = 0                 # W1: rows [ 0,16), cols [0,32)
W2_R0 = D_IN              # W2: rows [16,48), cols [0,16)
W3_R0 = D_IN + H1         # W3: rows [48,64), cols [0, 2)
P_R0 = D_IN + H1 + H2     # vector rows [64,80): 0 g0, 1 g1, 2 be1, 3 g2, 4 be2, 5 bi3
SLAB_ROWS = P_R0 + 16     # 80 (multiple of 16)


def mlp_kernel(x_ref, slab_ref, out_ref):
    """Whole-model forward in one Pallas invocation (small shapes, all in VMEM)."""

    def bn_scale_shift(h, gamma, beta):
        # Training-mode BatchNorm1d fused to one per-feature scale+shift:
        #   y = h*s + t,  s = gamma*rsqrt(var+eps),  t = beta - mean*s
        # One-pass biased variance, clamped at 0 against catastrophic cancellation.
        mean = jnp.mean(h, axis=0, keepdims=True)
        var = jnp.maximum(
            jnp.mean(h * h, axis=0, keepdims=True) - mean * mean, 0.0)
        s = gamma * jax.lax.rsqrt(var + BN_EPS)
        t = beta - mean * s
        return h * s + t

    def leaky_relu(h):
        # slope < 1  =>  max(h, slope*h) == LeakyReLU(h); single VPU max.
        return jnp.maximum(h, NEG_SLOPE * h)

    x = x_ref[...].astype(jnp.float32)                       # (N, 16)

    # Load the (tile-aligned) vector-parameter block once; slice as values in f32.
    pv = slab_ref[P_R0:P_R0 + 16, :].astype(jnp.float32)     # (16, 128)
    g0 = pv[0:1, 0:D_IN]
    g1, be1 = pv[1:2, 0:H1], pv[2:3, 0:H1]
    g2, be2 = pv[3:4, 0:H2], pv[4:5, 0:H2]
    bi3 = pv[5:6, 0:D_OUT]

    # ---- BN0 folded into the first matmul ----
    # BN0's shift (beta0 - mean0*s0) and the Linear bias bi1 are per-output-feature
    # constants after W1, so BN1 cancels them -> only the scale s0 is applied.
    mean0 = jnp.mean(x, axis=0, keepdims=True)
    var0 = jnp.maximum(
        jnp.mean(x * x, axis=0, keepdims=True) - mean0 * mean0, 0.0)
    s0 = g0 * jax.lax.rsqrt(var0 + BN_EPS)                   # (1, 16)

    w1 = slab_ref[W1_R0:W1_R0 + D_IN, 0:H1]                  # (16, 32) bf16
    h = jnp.dot((x * s0).astype(jnp.bfloat16), w1,
                preferred_element_type=jnp.float32)          # (N, 32) f32

    # ---- BN1 + LeakyReLU ----
    h = leaky_relu(bn_scale_shift(h, g1, be1))

    # ---- Linear(32->16) (bias dropped: cancelled by BN2) + BN2 + LeakyReLU ----
    w2 = slab_ref[W2_R0:W2_R0 + H1, 0:H2]                    # (32, 16) bf16
    h = jnp.dot(h.astype(jnp.bfloat16), w2,
                preferred_element_type=jnp.float32)          # (N, 16) f32
    h = leaky_relu(bn_scale_shift(h, g2, be2))

    # ---- Final Linear(16->2) ----
    w3 = slab_ref[W3_R0:W3_R0 + H2, 0:D_OUT]                 # (16, 2) bf16
    # (N, 2) output: last dim < 128 lanes lowers to a masked store; negligible here.
    out_ref[...] = (jnp.dot(h.astype(jnp.bfloat16), w3,
                            preferred_element_type=jnp.float32)
                    + bi3).astype(out_ref.dtype)


def mlp_forward(x, slab):
    n = x.shape[0]
    return pl.pallas_call(
        mlp_kernel,
        out_shape=jax.ShapeDtypeStruct((n, D_OUT), jnp.float32),
        in_specs=[pl.BlockSpec(memory_space=pltpu.MemorySpace.VMEM)] * 2,
        out_specs=pl.BlockSpec(memory_space=pltpu.MemorySpace.VMEM),
    )(x, slab)


def init_params(key, input_dim, hidden_sizes):
    """PyTorch-style init: Linear ~ U(-1/sqrt(fan_in), ...), BN gamma=1, beta=0."""
    dims = [input_dim] + list(hidden_sizes) + [2]
    params = {}
    params["g0"] = jnp.ones((1, input_dim), jnp.float32)
    params["b0"] = jnp.zeros((1, input_dim), jnp.float32)

    keys = jax.random.split(key, 2 * (len(dims) - 1))
    for i in range(len(dims) - 1):
        fan_in, fan_out = dims[i], dims[i + 1]
        bound = 1.0 / math.sqrt(fan_in)
        params[f"w{i + 1}"] = jax.random.uniform(
            keys[2 * i], (fan_in, fan_out), jnp.float32, minval=-bound, maxval=bound)
        params[f"bi{i + 1}"] = jax.random.uniform(
            keys[2 * i + 1], (1, fan_out), jnp.float32, minval=-bound, maxval=bound)
        if i < len(dims) - 2:
            params[f"g{i + 1}"] = jnp.ones((1, fan_out), jnp.float32)
            params[f"be{i + 1}"] = jnp.zeros((1, fan_out), jnp.float32)
    return params


def pack_params(params):
    """Pack all kernel-visible parameters into one pre-padded bf16 slab (80,128).

    Rows [ 0,16): W1 (cols [0,32))     Rows [16,48): W2 (cols [0,16))
    Rows [48,64): W3 (cols [0, 2))     Rows [64,80): vectors:
        64 g0, 65 g1, 66 be1, 67 g2, 68 be2, 69 bi3
    (b0, bi1, bi2 are intentionally absent: cancelled by the following BN.)
    """
    slab = jnp.zeros((SLAB_ROWS, SLAB_LANES), jnp.float32)
    slab = slab.at[W1_R0:W1_R0 + D_IN, 0:H1].set(params["w1"])
    slab = slab.at[W2_R0:W2_R0 + H1, 0:H2].set(params["w2"])
    slab = slab.at[W3_R0:W3_R0 + H2, 0:D_OUT].set(params["w3"])
    slab = slab.at[P_R0 + 0, 0:D_IN].set(params["g0"][0])
    slab = slab.at[P_R0 + 1, 0:H1].set(params["g1"][0])
    slab = slab.at[P_R0 + 2, 0:H1].set(params["be1"][0])
    slab = slab.at[P_R0 + 3, 0:H2].set(params["g2"][0])
    slab = slab.at[P_R0 + 4, 0:H2].set(params["be2"][0])
    slab = slab.at[P_R0 + 5, 0:D_OUT].set(params["bi3"][0])
    return slab.astype(jnp.bfloat16)


def reference_forward(x, params):
    """Pure-JAX f32 reference of the unmodified PyTorch forward (keeps b0/bi1/bi2,
    two-pass variance) — validates bias-cancellation / BN-fusion / bf16 rewrites."""
    def bn(h, g, b):
        m = jnp.mean(h, axis=0, keepdims=True)
        v = jnp.mean((h - m) ** 2, axis=0, keepdims=True)
        return (h - m) / jnp.sqrt(v + BN_EPS) * g + b

    def lrelu(h):
        return jnp.where(h > 0, h, NEG_SLOPE * h)

    h = bn(x, params["g0"], params["b0"])
    h = lrelu(bn(h @ params["w1"] + params["bi1"], params["g1"], params["be1"]))
    h = lrelu(bn(h @ params["w2"] + params["bi2"], params["g2"], params["be2"]))
    return h @ params["w3"] + params["bi3"]


if __name__ == "__main__":
    input_dim = D_IN
    hidden_sizes = [H1, H2]
    batch = 8

    key = jax.random.PRNGKey(0)
    kx, kp = jax.random.split(key)
    x = jax.random.normal(kx, (batch, input_dim), jnp.float32)
    params = init_params(kp, input_dim, hidden_sizes)
    slab = pack_params(params)

    out = mlp_forward(x, slab)
    jax.block_until_ready(out)

    ref = reference_forward(x, params)
    assert out.shape == (batch, D_OUT)
    # Tolerance loosened vs. the pure-f32 version: weights & matmul operands are
    # bf16 (MXU-native), introducing ~1e-3..1e-2 absolute deviation after 3 layers.
    assert jnp.allclose(out, ref, atol=3e-2, rtol=3e-2), (
        f"max abs err {float(jnp.max(jnp.abs(out - ref)))}")

    print("KERNEL_OK")
</pallas_src>

<mosaic_0001>
module attributes {stable_mosaic.version = 11 : i64} {
  func.func @mlp_kernel(%arg0: memref<8x16xf32, #tpu.memory_space<vmem>>, %arg1: memref<80x128xbf16, #tpu.memory_space<vmem>>, %arg2: memref<8x2xf32, #tpu.memory_space<vmem>>) attributes {dimension_semantics = [], scalar_prefetch = 0 : i64, scratch_operands = 0 : i64, tpu.core_type = #tpu.core_type<tc>} {
    %c0 = arith.constant 0 : index
    %c0_0 = arith.constant 0 : index
    %0 = vector.load %arg0[%c0, %c0_0] : memref<8x16xf32, #tpu.memory_space<vmem>>, vector<8x16xf32>
    %c64 = arith.constant 64 : index
    %c0_1 = arith.constant 0 : index
    %1 = vector.load %arg1[%c64, %c0_1] : memref<80x128xbf16, #tpu.memory_space<vmem>>, vector<16x128xbf16>
    %2 = arith.extf %1 : vector<16x128xbf16> to vector<16x128xf32>
    %3 = vector.extract_strided_slice %2 {offsets = [0, 0], sizes = [1, 16], strides = [1, 1]} : vector<16x128xf32> to vector<1x16xf32>
    %4 = vector.extract_strided_slice %2 {offsets = [1, 0], sizes = [1, 32], strides = [1, 1]} : vector<16x128xf32> to vector<1x32xf32>
    %5 = vector.extract_strided_slice %2 {offsets = [2, 0], sizes = [1, 32], strides = [1, 1]} : vector<16x128xf32> to vector<1x32xf32>
    %6 = vector.extract_strided_slice %2 {offsets = [3, 0], sizes = [1, 16], strides = [1, 1]} : vector<16x128xf32> to vector<1x16xf32>
    %7 = vector.extract_strided_slice %2 {offsets = [4, 0], sizes = [1, 16], strides = [1, 1]} : vector<16x128xf32> to vector<1x16xf32>
    %8 = vector.extract_strided_slice %2 {offsets = [5, 0], sizes = [1, 2], strides = [1, 1]} : vector<16x128xf32> to vector<1x2xf32>
    %cst = arith.constant dense<0.000000e+00> : vector<16xf32>
    %9 = vector.multi_reduction <add>, %0, %cst [0] : vector<8x16xf32> to vector<16xf32>
    %10 = vector.shape_cast %9 : vector<16xf32> to vector<1x16xf32>
    %cst_2 = arith.constant 8.000000e+00 : f32
    %11 = vector.broadcast %cst_2 : f32 to vector<1x16xf32>
    %12 = arith.divf %10, %11 : vector<1x16xf32>
    %13 = arith.mulf %0, %0 : vector<8x16xf32>
    %cst_3 = arith.constant dense<0.000000e+00> : vector<16xf32>
    %14 = vector.multi_reduction <add>, %13, %cst_3 [0] : vector<8x16xf32> to vector<16xf32>
    %15 = vector.shape_cast %14 : vector<16xf32> to vector<1x16xf32>
    %cst_4 = arith.constant 8.000000e+00 : f32
    %16 = vector.broadcast %cst_4 : f32 to vector<1x16xf32>
    %17 = arith.divf %15, %16 : vector<1x16xf32>
    %18 = arith.mulf %12, %12 : vector<1x16xf32>
    %19 = arith.subf %17, %18 : vector<1x16xf32>
    %cst_5 = arith.constant 0.000000e+00 : f32
    %20 = vector.broadcast %cst_5 : f32 to vector<1x16xf32>
    %21 = arith.maximumf %19, %20 : vector<1x16xf32>
    %cst_6 = arith.constant 9.99999974E-6 : f32
    %22 = vector.broadcast %cst_6 : f32 to vector<1x16xf32>
    %23 = arith.addf %21, %22 : vector<1x16xf32>
    %24 = math.rsqrt %23 : vector<1x16xf32>
    %25 = arith.mulf %3, %24 : vector<1x16xf32>
    %c0_7 = arith.constant 0 : index
    %c0_8 = arith.constant 0 : index
    %26 = vector.load %arg1[%c0_7, %c0_8] : memref<80x128xbf16, #tpu.memory_space<vmem>>, vector<16x32xbf16>
    %27 = vector.broadcast %25 : vector<1x16xf32> to vector<8x16xf32>
    %28 = arith.mulf %0, %27 : vector<8x16xf32>
    %29 = arith.truncf %28 : vector<8x16xf32> to vector<8x16xbf16>
    %cst_9 = arith.constant dense<0.000000e+00> : vector<8x32xf32>
    %30 = tpu.matmul %29, %26, %cst_9 {dimension_numbers = #tpu.dot_dimension_numbers<[1], [0], [0], [1], [0, 0, 1, 1], [], []>} : vector<8x16xbf16>, vector<16x32xbf16>, vector<8x32xf32> -> vector<8x32xf32>
    %cst_10 = arith.constant dense<0.000000e+00> : vector<32xf32>
    %31 = vector.multi_reduction <add>, %30, %cst_10 [0] : vector<8x32xf32> to vector<32xf32>
    %32 = vector.shape_cast %31 : vector<32xf32> to vector<1x32xf32>
    %cst_11 = arith.constant 8.000000e+00 : f32
    %33 = vector.broadcast %cst_11 : f32 to vector<1x32xf32>
    %34 = arith.divf %32, %33 : vector<1x32xf32>
    %35 = arith.mulf %30, %30 : vector<8x32xf32>
    %cst_12 = arith.constant dense<0.000000e+00> : vector<32xf32>
    %36 = vector.multi_reduction <add>, %35, %cst_12 [0] : vector<8x32xf32> to vector<32xf32>
    %37 = vector.shape_cast %36 : vector<32xf32> to vector<1x32xf32>
    %cst_13 = arith.constant 8.000000e+00 : f32
    %38 = vector.broadcast %cst_13 : f32 to vector<1x32xf32>
    %39 = arith.divf %37, %38 : vector<1x32xf32>
    %40 = arith.mulf %34, %34 : vector<1x32xf32>
    %41 = arith.subf %39, %40 : vector<1x32xf32>
    %cst_14 = arith.constant 0.000000e+00 : f32
    %42 = vector.broadcast %cst_14 : f32 to vector<1x32xf32>
    %43 = arith.maximumf %41, %42 : vector<1x32xf32>
    %cst_15 = arith.constant 9.99999974E-6 : f32
    %44 = vector.broadcast %cst_15 : f32 to vector<1x32xf32>
    %45 = arith.addf %43, %44 : vector<1x32xf32>
    %46 = math.rsqrt %45 : vector<1x32xf32>
    %47 = arith.mulf %4, %46 : vector<1x32xf32>
    %48 = arith.mulf %34, %47 : vector<1x32xf32>
    %49 = arith.subf %5, %48 : vector<1x32xf32>
    %50 = vector.broadcast %47 : vector<1x32xf32> to vector<8x32xf32>
    %51 = arith.mulf %30, %50 : vector<8x32xf32>
    %52 = vector.broadcast %49 : vector<1x32xf32> to vector<8x32xf32>
    %53 = arith.addf %51, %52 : vector<8x32xf32>
    %cst_16 = arith.constant 1.000000e-01 : f32
    %54 = vector.broadcast %cst_16 : f32 to vector<8x32xf32>
    %55 = arith.mulf %54, %53 : vector<8x32xf32>
    %56 = arith.maximumf %53, %55 : vector<8x32xf32>
    %c16 = arith.constant 16 : index
    %c0_17 = arith.constant 0 : index
    %57 = vector.load %arg1[%c16, %c0_17] : memref<80x128xbf16, #tpu.memory_space<vmem>>, vector<32x16xbf16>
    %58 = arith.truncf %56 : vector<8x32xf32> to vector<8x32xbf16>
    %cst_18 = arith.constant dense<0.000000e+00> : vector<8x16xf32>
    %59 = tpu.matmul %58, %57, %cst_18 {dimension_numbers = #tpu.dot_dimension_numbers<[1], [0], [0], [1], [0, 0, 1, 1], [], []>} : vector<8x32xbf16>, vector<32x16xbf16>, vector<8x16xf32> -> vector<8x16xf32>
    %cst_19 = arith.constant dense<0.000000e+00> : vector<16xf32>
    %60 = vector.multi_reduction <add>, %59, %cst_19 [0] : vector<8x16xf32> to vector<16xf32>
    %61 = vector.shape_cast %60 : vector<16xf32> to vector<1x16xf32>
    %cst_20 = arith.constant 8.000000e+00 : f32
    %62 = vector.broadcast %cst_20 : f32 to vector<1x16xf32>
    %63 = arith.divf %61, %62 : vector<1x16xf32>
    %64 = arith.mulf %59, %59 : vector<8x16xf32>
    %cst_21 = arith.constant dense<0.000000e+00> : vector<16xf32>
    %65 = vector.multi_reduction <add>, %64, %cst_21 [0] : vector<8x16xf32> to vector<16xf32>
    %66 = vector.shape_cast %65 : vector<16xf32> to vector<1x16xf32>
    %cst_22 = arith.constant 8.000000e+00 : f32
    %67 = vector.broadcast %cst_22 : f32 to vector<1x16xf32>
    %68 = arith.divf %66, %67 : vector<1x16xf32>
    %69 = arith.mulf %63, %63 : vector<1x16xf32>
    %70 = arith.subf %68, %69 : vector<1x16xf32>
    %cst_23 = arith.constant 0.000000e+00 : f32
    %71 = vector.broadcast %cst_23 : f32 to vector<1x16xf32>
    %72 = arith.maximumf %70, %71 : vector<1x16xf32>
    %cst_24 = arith.constant 9.99999974E-6 : f32
    %73 = vector.broadcast %cst_24 : f32 to vector<1x16xf32>
    %74 = arith.addf %72, %73 : vector<1x16xf32>
    %75 = math.rsqrt %74 : vector<1x16xf32>
    %76 = arith.mulf %6, %75 : vector<1x16xf32>
    %77 = arith.mulf %63, %76 : vector<1x16xf32>
    %78 = arith.subf %7, %77 : vector<1x16xf32>
    %79 = vector.broadcast %76 : vector<1x16xf32> to vector<8x16xf32>
    %80 = arith.mulf %59, %79 : vector<8x16xf32>
    %81 = vector.broadcast %78 : vector<1x16xf32> to vector<8x16xf32>
    %82 = arith.addf %80, %81 : vector<8x16xf32>
    %cst_25 = arith.constant 1.000000e-01 : f32
    %83 = vector.broadcast %cst_25 : f32 to vector<8x16xf32>
    %84 = arith.mulf %83, %82 : vector<8x16xf32>
    %85 = arith.maximumf %82, %84 : vector<8x16xf32>
    %c48 = arith.constant 48 : index
    %c0_26 = arith.constant 0 : index
    %86 = vector.load %arg1[%c48, %c0_26] : memref<80x128xbf16, #tpu.memory_space<vmem>>, vector<16x2xbf16>
    %87 = arith.truncf %85 : vector<8x16xf32> to vector<8x16xbf16>
    %cst_27 = arith.constant dense<0.000000e+00> : vector<8x2xf32>
    %88 = tpu.matmul %87, %86, %cst_27 {dimension_numbers = #tpu.dot_dimension_numbers<[1], [0], [0], [1], [0, 0, 1, 1], [], []>} : vector<8x16xbf16>, vector<16x2xbf16>, vector<8x2xf32> -> vector<8x2xf32>
    %89 = vector.broadcast %8 : vector<1x2xf32> to vector<8x2xf32>
    %90 = arith.addf %88, %89 : vector<8x2xf32>
    %c0_28 = arith.constant 0 : index
    %c0_29 = arith.constant 0 : index
    %91 = vector.load %arg2[%c0_28, %c0_29] : memref<8x2xf32, #tpu.memory_space<vmem>>, vector<8x2xf32>
    tpu.vector_store %arg2[%c0_28, %c0_29], %90 {strides = array<i32>} : memref<8x2xf32, #tpu.memory_space<vmem>>, vector<8x2xf32>,
    return
  }
}

</mosaic_0001>

<bundles_post_ra>
// kernel: tpu_custom_call.1
= control target key start
LH: loop header
LB: loop body
LE: loop exit
PB: predicated region body
PF: predicated region fallthrough
CT: control target
= control target key end

     0   :  { %7 = vsyncpa [#allocation3], 0  ;;  %s408_s0 = inlined_call_operand.hbm [shape: f32[8,16], index: 0, kind: input, shape index: {}]   ;;  %s409_s1 = inlined_call_operand.hbm [shape: bf16[80,128], index: 1, kind: input, shape index: {}]   ;;  %s410_s2 = inlined_call_operand.vmem [shape: f32[8,2], index: 2, kind: output, shape index: {}]  }
   0x1   :  { %s14_s11 = sshll.u32 %s408_s0, 4  ;;  %s15_s11 = int_to_ptr.hbm [resolvable:$true] %s14_s11 }
   0x2   :  { %8 = vsyncpa [#allocation5], 0  ;;  %s354_s12 = smov [#allocation2]   ;;  %s24_s16 = sshll.u32 %s409_s1, 4  ;;  %s25_s16 = int_to_ptr.hbm [resolvable:$true] %s24_s16 }
   0x3   :  { %s16_s13 = sshll.u32 %s354_s12, 4  ;;  %s355_s17 = smov [#allocation4]   ;;  %s17_s13 = int_to_ptr.vmem [resolvable:$true] %s16_s13 }
   0x4   :  { %19 = dma.hbm_to_vmem [thread:$0]  %s15_s11, 128, %s17_s13, [#allocation3]  }
   0x5   :  { %s26_s18 = sshll.u32 %s355_s17, 4  ;;  %s356_s19 = smov 64   ;;  %s27_s18 = int_to_ptr.vmem [resolvable:$true] %s26_s18 }
   0x6   :  { %s357_s20 = smov 4  }
   0x7   :  { %32 = dma.hbm_to_vmem [thread:$0]  %s25_s16, 640, %s27_s18, [#allocation5], %s356_s19, %s356_s19, %s357_s20  }
   0x8   :  { %350 = dma.done.wait [#allocation3], 128  }
   0x9   :  { %351 = vsyncadd [#allocation3], 4294967168 }
   0xa   :  { %352 = dma.done.wait [#allocation5], 640  }
   0xb   :  { %353 = vsyncadd [#allocation5], 4294966656  ;;  %v358_v0 = vmov 8.0   ;;  %vm45_vm0 = vcmask 130048   ;;  %v285_v2 = vld [vmem:[#allocation4] sm:$0xff]  ;;  %v42_v3 = vld [vmem:[#allocation2] sm:$0xff] }
   0xc   :  { %294 = vrcp.f32 %v358_v0  ;;  %v46_v4 = vsel %vm45_vm0, %v42_v3, 0.0  ;;  %106 = vmatpush.bf16.msra.mxu0 %v285_v2  ;;  %v61_v7 = vmul.f32 %v42_v3, %v42_v3  ;;  %v43_v33 = vld [vmem:[#allocation4 + $0x20] sm:$0xf]  ;;  %v287_v43 = vld [vmem:[#allocation4 + $0x10] sm:$0xff]  ;;  %v286_v44 = vld [vmem:[#allocation4 + $0x8] sm:$0xff]  ;;  %vm112_vm5 = vcmask 261120  }
   0xd   :  { %v47_v6 = vrot.slane %v46_v4, 4  ;;  %v386_v36 = vunpack.c.l.bf16 %v43_v33  ;;  %182 = vmatpush.bf16.msra.mxu1 %v287_v43  ;;  %vm258_vm12 = vcmask 15360  }
   0xe   :  { %v62_v10 = vsel %vm45_vm0, %v61_v7, 0.0 }
   0xf   :  { %v48_v9 = vadd.f32 %v47_v6, %v46_v4  ;;  %v63_v12 = vrot.slane %v62_v10, 4 }
  0x11   :  { %v49_v13 = vrot.slane %v48_v9, 2  ;;  %v64_v15 = vadd.f32 %v63_v12, %v62_v10  ;;  %183 = vmatpush.bf16.msra.mxu1 %v286_v44 }
  0x12   :  { %v295_v1 = vpop.eup %294 }
  0x13   :  { %v54_v5 = vmul.f32 8.0, %v295_v1  ;;  %v50_v16 = vadd.f32 %v49_v13, %v48_v9  ;;  %vm58_vm1 = vweird.f32 %v295_v1  ;;  %v65_v17 = vrot.slane %v64_v15, 2 }
  0x15   :  { %v55_v8 = vsub.f32 1.0, %v54_v5  ;;  %v51_v18 = vrot.slane %v50_v16, 1  ;;  %v66_v20 = vadd.f32 %v65_v17, %v64_v15 }
  0x17   :  { %v56_v11 = vmul.f32 %v295_v1, %v55_v8  ;;  %v52_v21 = vadd.f32 %v51_v18, %v50_v16  ;;  %v67_v22 = vrot.slane %v66_v20, 1 }
  0x19   :  { %v57_v14 = vadd.f32 %v295_v1, %v56_v11  ;;  %v68_v24 = vadd.f32 %v67_v22, %v66_v20 }
  0x1b   :  { %v382_v19 = vsel %vm58_vm1, %v295_v1, %v57_v14 }
  0x1c   :  { %v60_v23 = vmul.f32 %v382_v19, %v52_v21  ;;  %v69_v26 = vmul.f32 %v68_v24, %v382_v19 }
  0x1e   :  { %v70_v25 = vmul.f32 %v60_v23, %v60_v23 }
  0x20   :  { %v71_v27 = vsub.f32 %v69_v26, %v70_v25 }
  0x22   :  { %v72_v28 = vmax.f32 %v71_v27, 0.0 }
  0x24   :  { %v73_v29 = vadd.f32 1e-05, %v72_v28 }
  0x26   :  { %296 = vrsqrt.f32 %v73_v29  ;;  %vm80_vm2 = vweird.f32 %v73_v29 }
  0x2c   :  { %v297_v30 = vpop.eup %296 }
  0x2d   :  { %v75_v31 = vmul.f32 %v297_v30, %v73_v29  ;;  %vm81_vm3 = vweird.f32 %v297_v30 }
  0x2e   :  { %vm82_vm4 = vmor %vm80_vm2, %vm81_vm3 }
  0x2f   :  { %v76_v32 = vmul.f32 %v297_v30, %v75_v31 }
  0x31   :  { %v77_v34 = vmul.f32 0.5, %v76_v32 }
  0x33   :  { %v78_v35 = vsub.f32 1.5, %v77_v34 }
  0x35   :  { %v79_v37 = vmul.f32 %v297_v30, %v78_v35 }
  0x37   :  { %v83_v38 = vsel %vm82_vm4, %v297_v30, %v79_v37 }
  0x38   :  { %v84_v39 = vmul.f32 %v83_v38, %v386_v36 }
  0x3a   :  { %v87_v40 = vperm.slane %v84_v39, 0 }
  0x3c   :  { %v88_v41 = vmul.f32 %v87_v40, %v42_v3 }
  0x3e   :  { %v89_v42 = vpack.c.bf16 %v88_v41, %v88_v41 }
  0x40   :  { %270 = vmatmul.msk.bf16.vlgmr.msra.gmra.mxu0 %vm45_vm0, %v89_v42 }
  0xbd   :  { %v108_v45 = vpop.f32.mrf.mxu0 }
  0xbe   :  { %v121_v46 = vmul.f32 %v108_v45, %v108_v45  ;;  %v113_v47 = vsel %vm112_vm5, %v108_v45, 0.0 }
  0xbf   :  { %v114_v48 = vrot.slane %v113_v47, 4 }
  0xc0   :  { %v122_v49 = vsel %vm112_vm5, %v121_v46, 0.0  ;;  %v288_v46 = vld [vmem:[#allocation4 + $0x18] sm:$0xff] }
  0xc1   :  { %v115_v50 = vadd.f32 %v114_v48, %v113_v47  ;;  %v123_v51 = vrot.slane %v122_v49, 4  ;;  %252 = vmatpush.bf16.msra.mxu2 %v288_v46 }
  0xc3   :  { %v116_v52 = vrot.slane %v115_v50, 2  ;;  %v124_v53 = vadd.f32 %v123_v51, %v122_v49 }
  0xc5   :  { %v110_v54 = vpop.f32.mrf.mxu0  ;;  %v117_v55 = vadd.f32 %v116_v52, %v115_v50  ;;  %v125_v56 = vrot.slane %v124_v53, 2 }
  0xc7   :  { %v118_v57 = vrot.slane %v117_v55, 1  ;;  %v126_v58 = vadd.f32 %v125_v56, %v124_v53 }
  0xc9   :  { %v119_v59 = vadd.f32 %v118_v57, %v117_v55  ;;  %v127_v60 = vrot.slane %v126_v58, 1 }
  0xcb   :  { %v120_v61 = vmul.f32 %v119_v59, %v382_v19  ;;  %v128_v62 = vadd.f32 %v127_v60, %v126_v58 }
  0xcd   :  { %v129_v63 = vmul.f32 %v128_v62, %v382_v19  ;;  %v130_v0 = vmul.f32 %v120_v61, %v120_v61 }
  0xcf   :  { %v131_v1 = vsub.f32 %v129_v63, %v130_v0 }
  0xd1   :  { %v132_v2 = vmax.f32 %v131_v1, 0.0  ;;  %v235_v1 = vperm.slane %v386_v36, 5 }
  0xd3   :  { %v133_v3 = vadd.f32 1e-05, %v132_v2 }
  0xd5   :  { %298 = vrsqrt.f32 %v133_v3  ;;  %vm140_vm7 = vweird.f32 %v133_v3 }
  0xdb   :  { %v299_v4 = vpop.eup %298 }
  0xdc   :  { %v135_v5 = vmul.f32 %v299_v4, %v133_v3  ;;  %vm141_vm6 = vweird.f32 %v299_v4 }
  0xdd   :  { %vm142_vm8 = vmor %vm140_vm7, %vm141_vm6 }
  0xde   :  { %v136_v6 = vmul.f32 %v299_v4, %v135_v5 }
  0xe0   :  { %v137_v7 = vmul.f32 0.5, %v136_v6 }
  0xe2   :  { %v138_v8 = vsub.f32 1.5, %v137_v7 }
  0xe4   :  { %v139_v9 = vmul.f32 %v299_v4, %v138_v8 }
  0xe6   :  { %v143_v10 = vsel %vm142_vm8, %v299_v4, %v139_v9 }
  0xe7   :  { %v144_v11 = vmul.f32 %v143_v10, %v386_v36 }
  0xe9   :  { %v145_v12 = vmul.f32 %v144_v11, %v120_v61  ;;  %v150_v14 = vperm.slane %v144_v11, 1 }
  0xeb   :  { %v147_v13 = vrot.slane %v145_v12, 7  ;;  %v151_v16 = vmul.f32 %v150_v14, %v108_v45 }
  0xed   :  { %v149_v15 = vsub.f32 %v386_v36, %v147_v13 }
  0xef   :  { %v152_v17 = vperm.slane %v149_v15, 2 }
  0xf1   :  { %v153_v18 = vadd.f32 %v152_v17, %v151_v16 }
  0xf3   :  { %v154_v20 = vmul.f32 0.1, %v153_v18 }
  0xf5   :  { %v155_v21 = vmax.f32 %v153_v18, %v154_v20 }
  0xf7   :  { %v160_v22 = vpack.c.bf16 %v155_v21, %v155_v21 }
  0xf9   :  { %279 = vmatmul.msk.bf16.vlgmr.msra.gmra.mxu1 %vm112_vm5, %v160_v22 }
 0x176   :  { %v185_v23 = vpop.f32.mrf.mxu1 }
 0x177   :  { %v189_v24 = vsel %vm45_vm0, %v185_v23, 0.0  ;;  %v197_v25 = vmul.f32 %v185_v23, %v185_v23 }
 0x178   :  { %v190_v26 = vrot.slane %v189_v24, 4 }
 0x179   :  { %v198_v27 = vsel %vm45_vm0, %v197_v25, 0.0 }
 0x17a   :  { %v191_v28 = vadd.f32 %v190_v26, %v189_v24  ;;  %v199_v29 = vrot.slane %v198_v27, 4 }
 0x17c   :  { %v192_v30 = vrot.slane %v191_v28, 2  ;;  %v200_v31 = vadd.f32 %v199_v29, %v198_v27 }
 0x17e   :  { %v193_v32 = vadd.f32 %v192_v30, %v191_v28  ;;  %v201_v33 = vrot.slane %v200_v31, 2  ;;  %v187_v34 = vpop.f32.mrf.mxu1 }
 0x180   :  { %v194_v35 = vrot.slane %v193_v32, 1  ;;  %v202_v37 = vadd.f32 %v201_v33, %v200_v31 }
 0x182   :  { %v195_v38 = vadd.f32 %v194_v35, %v193_v32  ;;  %v203_v39 = vrot.slane %v202_v37, 1 }
 0x184   :  { %v196_v40 = vmul.f32 %v195_v38, %v382_v19  ;;  %v204_v41 = vadd.f32 %v203_v39, %v202_v37 }
 0x186   :  { %v205_v42 = vmul.f32 %v204_v41, %v382_v19  ;;  %v206_v43 = vmul.f32 %v196_v40, %v196_v40 }
 0x188   :  { %v207_v44 = vsub.f32 %v205_v42, %v206_v43 }
 0x18a   :  { %v208_v45 = vmax.f32 %v207_v44, 0.0 }
 0x18c   :  { %v209_v47 = vadd.f32 1e-05, %v208_v45 }
 0x18e   :  { %300 = vrsqrt.f32 %v209_v47  ;;  %vm216_vm10 = vweird.f32 %v209_v47 }
 0x194   :  { %v301_v48 = vpop.eup %300 }
 0x195   :  { %v211_v49 = vmul.f32 %v301_v48, %v209_v47  ;;  %vm217_vm9 = vweird.f32 %v301_v48 }
 0x196   :  { %vm218_vm11 = vmor %vm216_vm10, %vm217_vm9 }
 0x197   :  { %v212_v50 = vmul.f32 %v301_v48, %v211_v49 }
 0x199   :  { %v213_v51 = vmul.f32 0.5, %v212_v50 }
 0x19b   :  { %v214_v52 = vsub.f32 1.5, %v213_v51 }
 0x19d   :  { %v215_v53 = vmul.f32 %v301_v48, %v214_v52 }
 0x19f   :  { %v219_v54 = vsel %vm218_vm11, %v301_v48, %v215_v53 }
 0x1a0   :  { %v220_v55 = vmul.f32 %v219_v54, %v386_v36 }
 0x1a2   :  { %v221_v19 = vmul.f32 %v220_v55, %v196_v40  ;;  %v226_v57 = vperm.slane %v220_v55, 3 }
 0x1a4   :  { %v223_v56 = vrot.slane %v221_v19, 7  ;;  %v227_v59 = vmul.f32 %v226_v57, %v185_v23 }
 0x1a6   :  { %v225_v58 = vsub.f32 %v386_v36, %v223_v56 }
 0x1a8   :  { %v228_v60 = vperm.slane %v225_v58, 4 }
 0x1aa   :  { %v229_v61 = vadd.f32 %v228_v60, %v227_v59 }
 0x1ac   :  { %v230_v62 = vmul.f32 0.1, %v229_v61 }
 0x1ae   :  { %v231_v63 = vmax.f32 %v229_v61, %v230_v62 }
 0x1b0   :  { %v234_v0 = vpack.c.bf16 %v231_v63, %v231_v63 }
 0x1b2   :  { %284 = vmatmul.msk.bf16.vlgmr.msra.gmra.mxu2 %vm45_vm0, %v234_v0 }
 0x235   :  { %v254_v2 = vpop.f32.mrf.mxu2 }
 0x236   :  { %v255_v3 = vadd.f32 %v254_v2, %v235_v1 }
 0x238   :  { %259 = vst.msk [vmem:[%s410_s2] sm:$0xff] %vm258_vm12, %v255_v3 }
 0x23d   :  { %v256_v4 = vpop.f32.mrf.mxu2 }
 0x23e   :  { %264 = vsyncpa [#allocation3], 1 }
 0x23f   :  { %265 = vsyncpa [#allocation5], 1 }

</bundles_post_ra>
